<compile_context>
chip_gen: v5e
topology: v5e:2x2
jax: 0.10.0
libtpu: 0.0.40
codegen_flags: <defaults>
</compile_context>

<pallas_src>
import functools
import math

import jax
import jax.numpy as jnp
import numpy as np
from jax.experimental import pallas as pl
from jax.experimental.pallas import tpu as pltpu


def _round_up(v, m):
    return -(-v // m) * m


def _cdiv(a, b):
    return -(-a // b)


# ---------------------------------------------------------------------------
# Kernel
# ---------------------------------------------------------------------------
def _downsample_kernel(x_ref, w_ref, shift_ref, o_ref):
    """One grid step = `tr` output image rows (2*tr input rows).

    x_ref:     (tr, 2, Wo, 2*Cin)  NHWC row-pair tile (kh is the size-2 dim)
    w_ref:     (2, 2*Cin, Cout)    conv weight with BN scale folded in (per kh)
    shift_ref: (1, Cout)           BN shift (+ conv bias), f32
    o_ref:     (tr*Wo, Cout)       flat NHWC output tile
    """
    tr, _, wo, k2 = x_ref.shape
    rows = tr * wo

    # bf16/f32 operands go straight into the MXU (f32 accumulation) whenever the
    # (tr, Wo, K2) -> (tr*Wo, K2) merge is layout-preserving for the streamed
    # dtype (Wo a multiple of the sublane pack).  Otherwise widen to f32 first,
    # which keeps the merge on the most mature relayout path.
    itemsize = np.dtype(x_ref.dtype).itemsize
    direct = itemsize >= 4 or wo % (8 * (4 // itemsize)) == 0
    cdt = x_ref.dtype if direct else jnp.float32

    x0 = x_ref[:, 0, :, :].astype(cdt).reshape(rows, k2)
    x1 = x_ref[:, 1, :, :].astype(cdt).reshape(rows, k2)
    w0 = w_ref[0].astype(cdt)
    w1 = w_ref[1].astype(cdt)

    acc = jnp.dot(x0, w0, preferred_element_type=jnp.float32)
    acc = acc + jnp.dot(x1, w1, preferred_element_type=jnp.float32)
    o_ref[...] = (acc + shift_ref[...]).astype(o_ref.dtype)


# ---------------------------------------------------------------------------
# Tiling / VMEM configuration
# ---------------------------------------------------------------------------
def _vmem_config():
    """(tile_budget_bytes, vmem_limit_bytes, two_tensorcores) per TPU generation."""
    vmem = None
    try:
        vmem = int(getattr(pltpu.get_tpu_info(), "vmem_capacity_bytes", 0)) or None
    except Exception:
        vmem = None
    if vmem is None or vmem <= 0:
        vmem = 64 * 1024 * 1024  # conservative: assume v7x-sized VMEM
    if vmem <= 96 * 1024 * 1024:
        # v7x: 64 MiB per TensorCore, 2 TensorCores per chip.
        return 20 * 1024 * 1024, 52 * 1024 * 1024, True
    # v5e / v6e: 128 MiB VMEM, single TensorCore.
    return 56 * 1024 * 1024, 100 * 1024 * 1024, False


def _pick_row_tile(R, wo, k2, cout, in_item, out_item,
                   vmem_budget, target_bytes, two_tc):
    """Image output rows processed per grid step.

    Sized so one step streams ~`target_bytes` of HBM traffic (amortizes the
    ~0.35 us per-step overhead) while all live tiles stay inside `vmem_budget`.
    On v7x the step count is forced even (>=2) so the parallel axis splits
    across both TensorCores.  `tr` is kept a multiple of `m` so the output
    block's second-minor dim (tr*Wo) stays a multiple of 8.
    """
    lane = 128
    sub_in = max(8, 32 // in_item)
    sub_out = max(8, 32 // out_item)
    direct = in_item >= 4 or wo % (8 * (4 // in_item)) == 0
    m = 1 if wo % 8 == 0 else 8 // math.gcd(wo, 8)

    def tile_bytes(tr):
        rows8 = _round_up(tr * wo, 8)
        x_in = tr * 2 * _round_up(wo, sub_in) * _round_up(k2, lane) * in_item
        x_mm = 2 * rows8 * _round_up(k2, lane) * (in_item if direct else 4)
        acc = rows8 * _round_up(cout, lane) * 4
        o_t = _round_up(tr * wo, sub_out) * _round_up(cout, lane) * out_item
        w_t = 2 * _round_up(k2, sub_in) * _round_up(cout, lane) * (
            in_item + (0 if direct else 4))
        # 2x on streamed tiles: BlockSpec double buffering.
        return 2 * x_in + x_mm + 2 * acc + 2 * o_t + w_t + 4 * lane * 4

    q_cap = max(1, _cdiv(R, m))
    # Largest tile (in units of m rows) that fits the per-step VMEM budget.
    if tile_bytes(m) > vmem_budget:
        q_fit = 1
    else:
        lo, hi = 1, q_cap
        while lo < hi:
            mid = (lo + hi + 1) // 2
            if tile_bytes(mid * m) <= vmem_budget:
                lo = mid
            else:
                hi = mid - 1
        q_fit = lo
    tr = q_fit * m

    # Shrink toward the streamed-bytes-per-step target.
    bytes_per_row = max(1, 2 * wo * k2 * in_item + wo * cout * out_item)
    rows_tgt = _cdiv(target_bytes, bytes_per_row)
    tr = max(m, min(tr, _round_up(rows_tgt, m), q_cap * m))

    # v7x: even number of grid steps (>=2) for the 2-TensorCore split.
    if two_tc and R > m:
        nsteps = _cdiv(R, tr)
        if nsteps == 1:
            nsteps = 2
        elif nsteps % 2 == 1:
            nsteps += 1
        tr = max(m, _round_up(_cdiv(R, nsteps), m))

    return min(tr, q_cap * m)


# ---------------------------------------------------------------------------
# Parameter folding (eval-mode BatchNorm folded into the conv weight)
# ---------------------------------------------------------------------------
def _fold_params(conv_w, conv_b, gamma, beta, run_mean, run_var, eps, stream_dtype):
    cout, cin = conv_w.shape[0], conv_w.shape[1]
    scale = gamma * jax.lax.rsqrt(run_var + eps)                    # (Cout,)
    shift = (conv_b - run_mean) * scale + beta                      # (Cout,)
    w = jnp.transpose(conv_w, (2, 3, 1, 0))                         # (kh, kw, Cin, Cout)
    w = w * scale[None, None, None, :]                              # fold BN scale
    w = w.reshape(2, 2 * cin, cout).astype(stream_dtype)            # j = kw*Cin + ci
    return w, shift.reshape(1, cout).astype(jnp.float32)


# ---------------------------------------------------------------------------
# Entry points
# ---------------------------------------------------------------------------
@functools.partial(jax.jit, static_argnames=("eps", "stream_dtype"))
def downsample_forward_nhwc(x_nhwc, conv_w, conv_b, gamma, beta, run_mean,
                            run_var, eps=1e-5, stream_dtype=None):
    """Fused Conv2d(k=2,s=2,p=0) + BatchNorm2d on an NHWC tensor.  Returns NHWC.

    `stream_dtype=None` streams activations/weights in x's own dtype (no extra
    HBM cast pass).  Pass jnp.bfloat16 explicitly to halve HBM traffic for f32
    inputs (accumulation stays f32).
    """
    N, H, W, Cin = x_nhwc.shape
    Cout = conv_w.shape[0]
    Ho, Wo = H // 2, W // 2
    out_dtype = x_nhwc.dtype
    stream = np.dtype(x_nhwc.dtype) if stream_dtype is None else np.dtype(stream_dtype)

    # Conv2d(k=2, s=2, p=0) drops a trailing odd row / column (PyTorch floor).
    if H != 2 * Ho or W != 2 * Wo:
        x_nhwc = x_nhwc[:, :2 * Ho, :2 * Wo, :]

    # Free (layout-preserving) view: stride-2 along W becomes a lane regroup
    # (W, Cin) -> (Wo, 2*Cin); stride-2 along H becomes the size-2 dim of an
    # image-row pair.  No patch tensor hits HBM.
    R = N * Ho
    M = R * Wo
    K2 = 2 * Cin
    x_view = x_nhwc.reshape(R, 2, Wo, K2)
    if x_view.dtype != stream:
        x_view = x_view.astype(stream)

    w, shift = _fold_params(conv_w, conv_b, gamma, beta, run_mean, run_var,
                            eps, stream)

    vmem_budget, vmem_limit, two_tc = _vmem_config()
    tr = _pick_row_tile(R, Wo, K2, Cout,
                        stream.itemsize, np.dtype(out_dtype).itemsize,
                        vmem_budget, 4 * 1024 * 1024, two_tc)
    nsteps = _cdiv(R, tr)

    cost = pl.CostEstimate(
        flops=4 * M * K2 * Cout,
        transcendentals=0,
        bytes_accessed=(M * 2 * K2 * stream.itemsize
                        + 2 * K2 * Cout * stream.itemsize + Cout * 4
                        + M * Cout * np.dtype(out_dtype).itemsize))

    out_flat = pl.pallas_call(
        _downsample_kernel,
        out_shape=jax.ShapeDtypeStruct((M, Cout), out_dtype),
        grid_spec=pltpu.PrefetchScalarGridSpec(
            num_scalar_prefetch=0,
            grid=(nsteps,),
            in_specs=[
                pl.BlockSpec((tr, 2, Wo, K2), lambda i: (i, 0, 0, 0)),
                pl.BlockSpec((2, K2, Cout), lambda i: (0, 0, 0)),
                pl.BlockSpec((1, Cout), lambda i: (0, 0)),
            ],
            out_specs=pl.BlockSpec((tr * Wo, Cout), lambda i: (i, 0)),
        ),
        compiler_params=pltpu.CompilerParams(
            dimension_semantics=("parallel",),
            vmem_limit_bytes=vmem_limit,
        ),
        cost_estimate=cost,
    )(x_view, w, shift)

    return out_flat.reshape(N, Ho, Wo, Cout)


@functools.partial(jax.jit, static_argnames=("eps", "stream_dtype"))
def downsample_forward(x, conv_w, conv_b, gamma, beta, run_mean, run_var,
                       eps=1e-5, stream_dtype=None):
    """PyTorch-layout entry point: x (N, Cin, H, W) -> (N, Cout, H//2, W//2).

    The NCHW<->NHWC transposes are boundary layout plumbing required by the
    PyTorch interface; NHWC pipelines should call `downsample_forward_nhwc`.
    """
    x_nhwc = jnp.transpose(x, (0, 2, 3, 1))
    out_nhwc = downsample_forward_nhwc(x_nhwc, conv_w, conv_b, gamma, beta,
                                       run_mean, run_var, eps=eps,
                                       stream_dtype=stream_dtype)
    return jnp.transpose(out_nhwc, (0, 3, 1, 2))


# ---------------------------------------------------------------------------
# Reference & self-test
# ---------------------------------------------------------------------------
def _reference(x, conv_w, conv_b, gamma, beta, run_mean, run_var, eps=1e-5):
    conv = jax.lax.conv_general_dilated(
        x, conv_w, window_strides=(2, 2), padding="VALID",
        dimension_numbers=("NCHW", "OIHW", "NCHW"),
        precision=jax.lax.Precision.HIGHEST)
    conv = conv + conv_b[None, :, None, None]
    inv = jax.lax.rsqrt(run_var + eps)
    return ((conv - run_mean[None, :, None, None]) * inv[None, :, None, None]
            * gamma[None, :, None, None] + beta[None, :, None, None])


def _make_params(key, cin, cout):
    kw, kb, kg, kbe, km, kv = jax.random.split(key, 6)
    conv_w = jax.random.normal(kw, (cout, cin, 2, 2), jnp.float32) * 0.1
    conv_b = jax.random.normal(kb, (cout,), jnp.float32) * 0.1
    gamma = 1.0 + 0.1 * jax.random.normal(kg, (cout,), jnp.float32)
    beta = 0.1 * jax.random.normal(kbe, (cout,), jnp.float32)
    run_mean = 0.1 * jax.random.normal(km, (cout,), jnp.float32)
    run_var = 1.0 + jax.nn.softplus(jax.random.normal(kv, (cout,), jnp.float32))
    return conv_w, conv_b, gamma, beta, run_mean, run_var


if __name__ == "__main__":
    key = jax.random.PRNGKey(0)
    k1, k2_, k3, k4 = jax.random.split(key, 4)

    # --- Case 1: f32 NCHW input (module-sized small shapes) --------------------
    N, Cin, H, W = 2, 4, 16, 16
    Cout = 8
    x = jax.random.normal(k1, (N, Cin, H, W), jnp.float32)
    params = _make_params(k2_, Cin, Cout)
    ref = _reference(x, *params)

    out_f32 = jax.block_until_ready(downsample_forward(x, *params))
    assert out_f32.shape == (N, Cout, H // 2, W // 2)
    assert jnp.allclose(out_f32, ref, atol=5e-3, rtol=5e-3), "f32 mismatch vs reference"

    # Explicit bf16 streaming (f32 accumulate) — looser tolerance.
    out_bf16 = jax.block_until_ready(
        downsample_forward(x, *params, stream_dtype=jnp.bfloat16))
    assert jnp.allclose(out_bf16, ref, atol=5e-2, rtol=5e-2), "bf16-stream mismatch"

    # Fully fused NHWC entry point (no boundary transposes).
    out_nhwc = jax.block_until_ready(downsample_forward_nhwc(
        jnp.transpose(x, (0, 2, 3, 1)), *params))
    assert jnp.allclose(jnp.transpose(out_nhwc, (0, 3, 1, 2)), ref,
                        atol=5e-3, rtol=5e-3), "nhwc mismatch vs reference"

    # --- Case 2: bf16 activations, Wo % 16 == 0 -> bf16 straight into the MXU --
    N2, Cin2, H2, W2, Cout2 = 2, 8, 32, 32, 16
    x2 = jax.random.normal(k3, (N2, Cin2, H2, W2), jnp.float32).astype(jnp.bfloat16)
    params2 = _make_params(k4, Cin2, Cout2)
    ref2 = _reference(x2.astype(jnp.float32), *params2)

    out2 = jax.block_until_ready(downsample_forward(x2, *params2))
    assert out2.shape == (N2, Cout2, H2 // 2, W2 // 2)
    assert jnp.allclose(out2.astype(jnp.float32), ref2,
                        atol=5e-2, rtol=5e-2), "bf16-direct mismatch vs reference"

    print("KERNEL_OK")
</pallas_src>

<mosaic_0001>
module attributes {stable_mosaic.version = 11 : i64} {
  func.func @_downsample_kernel(%arg0: i32, %arg1: memref<8x2x8x8xf32, #tpu.memory_space<vmem>>, %arg2: memref<2x8x8xf32, #tpu.memory_space<vmem>>, %arg3: memref<1x8xf32, #tpu.memory_space<vmem>>, %arg4: memref<64x8xf32, #tpu.memory_space<vmem>>) attributes {dimension_semantics = [#tpu.dimension_semantics<parallel>], iteration_bounds = array<i64: 2>, scalar_prefetch = 0 : i64, scratch_operands = 0 : i64, tpu.core_type = #tpu.core_type<tc>, window_params = [{transform_indices = @transform_0, window_bounds = array<i64: 8, 2, 8, 8>}, {pipeline_mode = #tpu.pipeline_mode<synchronous>, transform_indices = @transform_1, window_bounds = array<i64: 2, 8, 8>}, {pipeline_mode = #tpu.pipeline_mode<synchronous>, transform_indices = @transform_2, window_bounds = array<i64: 1, 8>}, {transform_indices = @transform_3, window_bounds = array<i64: 64, 8>}]} {
    %c0 = arith.constant 0 : index
    %c0_0 = arith.constant 0 : index
    %c0_1 = arith.constant 0 : index
    %c0_2 = arith.constant 0 : index
    %0 = vector.load %arg1[%c0, %c0_0, %c0_1, %c0_2] : memref<8x2x8x8xf32, #tpu.memory_space<vmem>>, vector<8x1x8x8xf32>
    %1 = vector.shape_cast %0 : vector<8x1x8x8xf32> to vector<8x8x8xf32>
    %2 = vector.shape_cast %1 : vector<8x8x8xf32> to vector<64x8xf32>
    %c0_3 = arith.constant 0 : index
    %c1 = arith.constant 1 : index
    %c0_4 = arith.constant 0 : index
    %c0_5 = arith.constant 0 : index
    %3 = vector.load %arg1[%c0_3, %c1, %c0_4, %c0_5] : memref<8x2x8x8xf32, #tpu.memory_space<vmem>>, vector<8x1x8x8xf32>
    %4 = vector.shape_cast %3 : vector<8x1x8x8xf32> to vector<8x8x8xf32>
    %5 = vector.shape_cast %4 : vector<8x8x8xf32> to vector<64x8xf32>
    %c0_6 = arith.constant 0 : index
    %c0_7 = arith.constant 0 : index
    %c0_8 = arith.constant 0 : index
    %6 = vector.load %arg2[%c0_6, %c0_7, %c0_8] : memref<2x8x8xf32, #tpu.memory_space<vmem>>, vector<1x8x8xf32>
    %7 = vector.shape_cast %6 : vector<1x8x8xf32> to vector<8x8xf32>
    %c1_9 = arith.constant 1 : index
    %c0_10 = arith.constant 0 : index
    %c0_11 = arith.constant 0 : index
    %8 = vector.load %arg2[%c1_9, %c0_10, %c0_11] : memref<2x8x8xf32, #tpu.memory_space<vmem>>, vector<1x8x8xf32>
    %9 = vector.shape_cast %8 : vector<1x8x8xf32> to vector<8x8xf32>
    %cst = arith.constant dense<0.000000e+00> : vector<64x8xf32>
    %10 = tpu.matmul %2, %7, %cst {dimension_numbers = #tpu.dot_dimension_numbers<[1], [0], [0], [1], [0, 0, 1, 1], [], []>} : vector<64x8xf32>, vector<8x8xf32>, vector<64x8xf32> -> vector<64x8xf32>
    %cst_12 = arith.constant dense<0.000000e+00> : vector<64x8xf32>
    %11 = tpu.matmul %5, %9, %cst_12 {dimension_numbers = #tpu.dot_dimension_numbers<[1], [0], [0], [1], [0, 0, 1, 1], [], []>} : vector<64x8xf32>, vector<8x8xf32>, vector<64x8xf32> -> vector<64x8xf32>
    %12 = arith.addf %10, %11 : vector<64x8xf32>
    %c0_13 = arith.constant 0 : index
    %c0_14 = arith.constant 0 : index
    %13 = vector.load %arg3[%c0_13, %c0_14] : memref<1x8xf32, #tpu.memory_space<vmem>>, vector<1x8xf32>
    %14 = vector.broadcast %13 : vector<1x8xf32> to vector<64x8xf32>
    %15 = arith.addf %12, %14 : vector<64x8xf32>
    %c0_15 = arith.constant 0 : index
    %c0_16 = arith.constant 0 : index
    %16 = vector.load %arg4[%c0_15, %c0_16] : memref<64x8xf32, #tpu.memory_space<vmem>>, vector<64x8xf32>
    tpu.vector_store %arg4[%c0_15, %c0_16], %15 {strides = array<i32>} : memref<64x8xf32, #tpu.memory_space<vmem>>, vector<64x8xf32>,
    return
  }
  func.func @transform_0(%arg0: i32) -> (i32, i32, i32, i32) {
    %c0_i32 = arith.constant 0 : i32
    %c0_i32_0 = arith.constant 0 : i32
    %c0_i32_1 = arith.constant 0 : i32
    %c0_i32_2 = arith.constant 0 : i32
    return %arg0, %c0_i32, %c0_i32_0, %c0_i32_1 : i32, i32, i32, i32
  }
  func.func @transform_1(%arg0: i32) -> (i32, i32, i32) {
    %c0_i32 = arith.constant 0 : i32
    %c0_i32_0 = arith.constant 0 : i32
    %c0_i32_1 = arith.constant 0 : i32
    %c0_i32_2 = arith.constant 0 : i32
    return %c0_i32, %c0_i32_0, %c0_i32_1 : i32, i32, i32
  }
  func.func @transform_2(%arg0: i32) -> (i32, i32) {
    %c0_i32 = arith.constant 0 : i32
    %c0_i32_0 = arith.constant 0 : i32
    %c0_i32_1 = arith.constant 0 : i32
    return %c0_i32, %c0_i32_0 : i32, i32
  }
  func.func @transform_3(%arg0: i32) -> (i32, i32) {
    %c0_i32 = arith.constant 0 : i32
    %c0_i32_0 = arith.constant 0 : i32
    return %arg0, %c0_i32 : i32, i32
  }
}

</mosaic_0001>

<bundles_post_ra>
// kernel: downsample_forward_nhwc.1
= control target key start
LH: loop header
LB: loop body
LE: loop exit
PB: predicated region body
PF: predicated region fallthrough
CT: control target
= control target key end

     0   :  { %8 = vsyncpa [#allocation3], 0  ;;  %s726_s0 = inlined_call_operand.vmem [shape: f32[16,2,8,8], index: 0, kind: input, shape index: {}]   ;;  %s727_s1 = inlined_call_operand.vmem [shape: f32[2,8,8], index: 1, kind: input, shape index: {}]   ;;  %s728_s2 = inlined_call_operand.vmem [shape: f32[1,8], index: 2, kind: input, shape index: {}]   ;;  %s729_s3 = inlined_call_operand.hbm [shape: f32[128,8], index: 3, kind: output, shape index: {}]  }
   0x1   :  { %10 = vsyncpa [#allocation3 + $0x1], 0  ;;  %s594_s12 = smov 0   ;;  %s596_s13 = smov 0  }
   0x2   :  { %s598_s14 = smov 0   ;;  %s600_s15 = smov 0  }
   0x3 LB: > { %s615_s16 = sadd.s32 4294967295, %s570_s15   ;;  %s424_s17 = sadd.s32 4294967294, %s570_s15   ;;  %s570_s15 = sphi %s600_s15, %s735_s15   ;;  %s566_s14 = sphi %s598_s14, %s734_s14   ;;  %s562_s13 = sphi %s596_s13, %s733_s13   ;;  %s558_s12 = sphi %s594_s12, %s732_s12  }
   0x4   : > { %s619_s18 = sadd.s32 1, %s570_s15   ;;  %s91_s19 = sadd.s32 1, %s566_s14 }
   0x5   : > { %s88_s20 = ssub.s32 %s570_s15, %s619_s18  ;;  %p101_p0 = scmp.ne.s32.totalorder %s566_s14, %s562_s13 }
   0x6   : > { %p89_p1 = scmp.eq.s32.totalorder %s88_s20, 0  ;;  %p102_p2 = scmp.eq.s32.totalorder %s615_s16, 1 }
   0x7   : > { %p107_p3 = scmp.ne.s32.totalorder %s562_s13, %s558_s12  ;;  %p108_p4 = scmp.eq.s32.totalorder %s424_s17, 1 }
   0x8   : > { %s630_s21 = scalar_select %p89_p1, %s566_s14, %s91_s19  }
   0x9   : > { %p632_p5 = por %p102_p2, %p101_p0  ;;  %p636_p6 = por %p108_p4, %p107_p3 }
   0xa   : > { %p427_p7 = scmp.ge.s32.totalorder %s570_s15, 1  ;;  %p142_p8 = scmp.lt.s32.totalorder %s570_s15, 3 }
   0xc   : > { %p143_p9 = pnand %p427_p7, %p142_p8 }
   0xd   : > { %s429_s28 = sshll.u32 (!%p143_p9), %s615_s16, 3  ;;  %s164_s6 = sand.u32 (!%p143_p9), 1, %s562_s13  }
   0xe   : > { %146 = sbr.rel (%p143_p9) target bundleno = 187 (0xbb), region = 32  ;;  %p168_p10 = scmp.lt.s32.totalorder (!%p143_p9), %s429_s28, 15 }
   0xf   : > { %s428_s7 = sshll.u32 (!%p143_p9), %s164_s6, 6  ;;  %s463_s11 = sshll.u32 (!%p143_p9), %s615_s16, 6 }
  0x10   : > { %s674_s10 = scalar_lea.vmem (!%p143_p9), [#allocation2], %s428_s7  ;;  %s358_s20 = scalar_lea.hbm (!%p143_p9), %s729_s3, %s463_s11 }
  0x11   : > { %s359_s24 = sshll.u32 (!%p143_p9), %s674_s10, 4  ;;  %s361_s25 = sshll.u32 (!%p143_p9), %s358_s20, 4  ;;  %s360_s24 = int_to_ptr.vmem [resolvable:$true] %s359_s24  ;;  %s362_s25 = int_to_ptr.hbm [resolvable:$true] %s361_s25 }
  0x12   : > { %s347_s16 = scalar_lea.sflag (!%p143_p9), [#allocation3], %s164_s6  ;;  %s522_s26 = sshra.s32 (!%p143_p9), %s362_s25, 4  ;;  %s523_s26 = int_to_ptr.hbm [resolvable:$true] %s522_s26 }
  0x13   : > { %v440_v0 = vld [vmem:[%s727_s1 + $0x8] sm:$0xff]  ;;  %v192_v1 = vld [vmem:[%s727_s1] sm:$0xff]  ;;  %s737_s28 = smov (!%p168_p10, %s429_s28), 15  ;;  %vm195_vm0 = vcmask 64512   ;;  %s524_s27 = scalar_lea.hbm %s523_s26, 64 }
  0x14   : > { %464 = vmatpush.msra.mxu2 %v440_v0  ;;  %465 = vmatpush.msra.mxu3 %v192_v1  ;;  %s462_s29 = sshll.u32 %s737_s28, 4  ;;  %v507_v18 = vld [vmem:[%s728_s2] ss:$0 sm:$0xff]  ;;  %p525_p11 = scmp.ne.s32.totalorder %s523_s26, %s524_s27 }
  0x15   : > { %235 = vmatpush.msra.mxu0 %v440_v0  ;;  %300 = vmatpush.msra.mxu1 %v192_v1  ;;  %s172_s5 = scalar_lea.vmem %s726_s0, %s462_s29  ;;  %s528_s30 = scalar_lea.hbm %s729_s3, 128 }
  0x16   : > { %v436_v2 = vld [vmem:[%s172_s5 + $0x48] sm:$0xff]  ;;  %v179_v3 = vld [vmem:[%s172_s5 + $0x40] sm:$0xff]  ;;  %v437_v6 = vld [vmem:[%s172_s5 + $0x58] sm:$0xff]  ;;  %p526_p12 = pnand %p525_p11, %p632_p5  ;;  %p529_p0 = scmp.lt.s32.totalorder %s523_s26, %s729_s3 }
  0x17   : > { %v432_v4 = vld [vmem:[%s172_s5 + $0x8] sm:$0xff]  ;;  %445 = vmatmul.msk.f32.vlgmr.msra.gmra.mxu2 %vm195_vm0, %v436_v2  ;;  %453 = vmatmul.msk.f32.vlgmr.msra.gmra.mxu3 %vm195_vm0, %v179_v3  ;;  %v175_v5 = vld [vmem:[%s172_s5] sm:$0xff]  ;;  %v180_v7 = vld [vmem:[%s172_s5 + $0x50] sm:$0xff]  ;;  %p530_p1 = scmp.lt.s32.totalorder %s528_s30, %s524_s27 }
  0x18   : > { %441 = vmatmul.msk.f32.vlgmr.msra.gmra.mxu0 %vm195_vm0, %v432_v4  ;;  %449 = vmatmul.msk.f32.vlgmr.msra.gmra.mxu1 %vm195_vm0, %v175_v5  ;;  %v433_v8 = vld [vmem:[%s172_s5 + $0x18] sm:$0xff]  ;;  %v176_v9 = vld [vmem:[%s172_s5 + $0x10] sm:$0xff]  ;;  %v438_v10 = vld [vmem:[%s172_s5 + $0x68] sm:$0xff]  ;;  %p527_p13 = pneg %p526_p12 }
  0x19   : > { %v181_v11 = vld [vmem:[%s172_s5 + $0x60] sm:$0xff]  ;;  %v434_v12 = vld [vmem:[%s172_s5 + $0x28] sm:$0xff]  ;;  %v439_v14 = vld [vmem:[%s172_s5 + $0x78] sm:$0xff]  ;;  %p531_p2 = por %p530_p1, %p529_p0 }
  0x1a   : > { %v177_v13 = vld [vmem:[%s172_s5 + $0x20] sm:$0xff]  ;;  %v182_v15 = vld [vmem:[%s172_s5 + $0x70] sm:$0xff]  ;;  %v435_v16 = vld [vmem:[%s172_s5 + $0x38] sm:$0xff] }
  0x1b   : > { %v178_v17 = vld [vmem:[%s172_s5 + $0x30] sm:$0xff]  ;;  %p532_p3 = pnand %p531_p2, %p527_p13 }
  0x1f   : > { %446 = vmatmul.msk.f32.gmra.mxu2 %vm195_vm0, %v437_v6  ;;  %454 = vmatmul.msk.f32.gmra.mxu3 %vm195_vm0, %v180_v7 }
  0x20   : > { %442 = vmatmul.msk.f32.gmra.mxu0 %vm195_vm0, %v433_v8  ;;  %450 = vmatmul.msk.f32.gmra.mxu1 %vm195_vm0, %v176_v9 }
  0x27   : > { %447 = vmatmul.msk.f32.gmra.mxu2 %vm195_vm0, %v438_v10  ;;  %455 = vmatmul.msk.f32.gmra.mxu3 %vm195_vm0, %v181_v11 }
  0x28   : > { %443 = vmatmul.msk.f32.gmra.mxu0 %vm195_vm0, %v434_v12  ;;  %451 = vmatmul.msk.f32.gmra.mxu1 %vm195_vm0, %v177_v13 }
  0x2f   : > { %448 = vmatmul.msk.f32.gmra.mxu2 %vm195_vm0, %v439_v14  ;;  %456 = vmatmul.msk.f32.gmra.mxu3 %vm195_vm0, %v182_v15 }
  0x30   : > { %444 = vmatmul.msk.f32.gmra.mxu0 %vm195_vm0, %v435_v16  ;;  %452 = vmatmul.msk.f32.gmra.mxu1 %vm195_vm0, %v178_v17 }
  0x95   : > { %v237_v19 = vpop.f32.mrf.mxu0  ;;  %v302_v20 = vpop.f32.mrf.mxu1 }
  0x96   : > { %v303_v21 = vadd.f32 %v302_v20, %v237_v19 }
  0x98   : > { %v330_v22 = vadd.f32 %v507_v18, %v303_v21 }
  0x9a   : > { %v249_v23 = vpop.f32.mrf.mxu2  ;;  %338 = vst.msk [vmem:[%s674_s10] sm:$0xff] %vm195_vm0, %v330_v22  ;;  %v314_v24 = vpop.f32.mrf.mxu3 }
  0x9b   : > { %v315_v25 = vadd.f32 %v314_v24, %v249_v23 }
  0x9d   : > { %v334_v26 = vadd.f32 %v507_v18, %v315_v25  ;;  %v240_v27 = vpop.f32.mrf.mxu0  ;;  %v305_v28 = vpop.f32.mrf.mxu1 }
  0x9e   : > { %v306_v29 = vadd.f32 %v305_v28, %v240_v27 }
  0x9f   : > { %342 = vst.msk [vmem:[%s674_s10 + $0x20] sm:$0xff] %vm195_vm0, %v334_v26 }
  0xa0   : > { %v331_v30 = vadd.f32 %v507_v18, %v306_v29 }
  0xa2   : > { %v252_v31 = vpop.f32.mrf.mxu2  ;;  %339 = vst.msk [vmem:[%s674_s10 + $0x8] sm:$0xff] %vm195_vm0, %v331_v30  ;;  %v317_v32 = vpop.f32.mrf.mxu3 }
  0xa3   : > { %v318_v33 = vadd.f32 %v317_v32, %v252_v31 }
  0xa5   : > { %v335_v34 = vadd.f32 %v507_v18, %v318_v33  ;;  %v243_v35 = vpop.f32.mrf.mxu0  ;;  %v308_v36 = vpop.f32.mrf.mxu1 }
  0xa6   : > { %v309_v37 = vadd.f32 %v308_v36, %v243_v35 }
  0xa7   : > { %343 = vst.msk [vmem:[%s674_s10 + $0x28] sm:$0xff] %vm195_vm0, %v335_v34 }
  0xa8   : > { %v332_v38 = vadd.f32 %v507_v18, %v309_v37 }
  0xaa   : > { %v255_v39 = vpop.f32.mrf.mxu2  ;;  %340 = vst.msk [vmem:[%s674_s10 + $0x10] sm:$0xff] %vm195_vm0, %v332_v38  ;;  %v320_v40 = vpop.f32.mrf.mxu3 }
  0xab   : > { %v321_v41 = vadd.f32 %v320_v40, %v255_v39 }
  0xad   : > { %v336_v42 = vadd.f32 %v507_v18, %v321_v41  ;;  %v246_v43 = vpop.f32.mrf.mxu0  ;;  %v311_v44 = vpop.f32.mrf.mxu1 }
  0xae   : > { %v312_v45 = vadd.f32 %v311_v44, %v246_v43 }
  0xaf   : > { %344 = vst.msk [vmem:[%s674_s10 + $0x30] sm:$0xff] %vm195_vm0, %v336_v42 }
  0xb0   : > { %v333_v46 = vadd.f32 %v507_v18, %v312_v45 }
  0xb2   : > { %v258_v47 = vpop.f32.mrf.mxu2  ;;  %341 = vst.msk [vmem:[%s674_s10 + $0x18] sm:$0xff] %vm195_vm0, %v333_v46  ;;  %v323_v48 = vpop.f32.mrf.mxu3 }
  0xb3   : > { %v324_v49 = vadd.f32 %v323_v48, %v258_v47 }
  0xb5   : > { %v337_v50 = vadd.f32 %v507_v18, %v324_v49 }
  0xb7   : > { %345 = vst.msk [vmem:[%s674_s10 + $0x38] sm:$0xff] %vm195_vm0, %v337_v50 }
  0xb8   : > { %535 = shalt.err (!%p532_p3)
}
  0xb9   : > { %s572_s6 = smov 128   ;;  %s573_s7 = smov 8  }
  0xba   : > { %466 = dma.vmem_to_hbm [thread:$0]  (%p632_p5), %s360_s24, 1024, %s362_s25, %s347_s16, %s572_s6, %s572_s6, %s573_s7  }
  0xbb PF: > { %p472_p4 = scmp.ge.s32.totalorder %s570_s15, 2  ;;  %s376_s8 = sand.u32 1, %s558_s12  }
  0xbc   : > { %s377_s9 = scalar_lea.sflag [#allocation3], %s376_s8 }
  0xbd   : > { %p469_p7 = pnand %p472_p4, %p636_p6 }
  0xbf   : > { %p470_p8 = pneg %p469_p7 }
  0xc1   : > { %553 = dma.done.wait (%p470_p8), %s377_s9, 1024  }
  0xc2   : > { %555 = vsyncadd (%p470_p8), %s377_s9, 4294966272  ;;  %p13_p9 = scmp.ge.s32.totalorder %s619_s18, 4   ;;  %s732_s12 = smov %s562_s13 }
  0xc3   : > { %s733_s13 = smov %s566_s14  ;;  %s734_s14 = smov %s630_s21 }
  0xc4   : > { %s735_s15 = smov %s619_s18  ;;  %15 = sbr.rel (!%p13_p9) target bundleno = 3 (0x3), region = 69 }
  0xc9   :  { %383 = vsyncpa [#allocation3], 1 }
  0xca   :  { %385 = vsyncpa [#allocation3 + $0x1], 1 }

</bundles_post_ra>
